<compile_context>
chip_gen: v5e
topology: v5e:2x2
jax: 0.10.0
libtpu: 0.0.40
codegen_flags: <defaults>
</compile_context>

<pallas_src>
import jax
import jax.numpy as jnp
from jax.experimental import pallas as pl
from jax.experimental.pallas import tpu as pltpu

LANE = 128
SUBLANE = 8


def _round_up(x, m):
    return ((x + m - 1) // m) * m


def _choose_tb(b8):
    """Pick a batch tile for a batch already rounded up to a multiple of 8.

    Largest tile whose round-up waste is <= 12.5% of the batch; if that leaves a
    single 512-row grid step, halve once so the grid has >= 2 steps (lets
    dimension_semantics=("parallel",) shard the batch across v7x's 2 TensorCores
    while keeping tiles >= 256 for v5e/v6e efficiency).
    """
    tb = SUBLANE
    for cand in (512, 256, 128, 64, 32, 16, 8):
        waste = _round_up(b8, cand) - b8
        if waste * 8 <= b8:          # <= 12.5% padded rows
            tb = cand
            break
    if _round_up(b8, tb) // tb == 1 and tb >= 512:
        tb //= 2
    return tb


# ----------------------------------------------------------------------------- kernel
def dqn_forward_kernel(x_ref, w1_ref, w2_ref, w3_ref, b_ref, out_ref):
    # Padded widths are static (from the Ref shapes).
    f1p = w1_ref.shape[1]
    f2p = w2_ref.shape[1]
    nap = w3_ref.shape[1]

    b = b_ref[...]                                   # (3, Wmax) f32, packed biases

    # fc1 + ReLU  (bf16 MXU operands, f32 accumulate, f32 bias/ReLU on VPU;
    # x arrives as bf16 already — no in-kernel cast of the input stream)
    h1 = jnp.dot(x_ref[...], w1_ref[...], preferred_element_type=jnp.float32)
    h1 = jnp.maximum(h1 + b[0:1, :f1p], 0.0)

    # fc2 + ReLU
    h2 = jnp.dot(h1.astype(jnp.bfloat16), w2_ref[...],
                 preferred_element_type=jnp.float32)
    h2 = jnp.maximum(h2 + b[1:2, :f2p], 0.0)

    # fc3 (no activation)
    a = jnp.dot(h2.astype(jnp.bfloat16), w3_ref[...],
                preferred_element_type=jnp.float32)
    out_ref[...] = (a + b[2:3, :nap]).astype(out_ref.dtype)


# ----------------------------------------------------------------------------- params
def init_dqn_params(key, input_dims, fc1_dims, fc2_dims, n_actions):
    """Logical f32 params, mirroring nn.Linear's U(-1/sqrt(fan_in), 1/sqrt(fan_in)).

    Weights stored as (in_features, out_features) so forward is x @ W + b.
    """
    def linear(k, fan_in, fan_out):
        kw, kb = jax.random.split(k)
        bound = 1.0 / jnp.sqrt(jnp.float32(fan_in))
        w = jax.random.uniform(kw, (fan_in, fan_out), jnp.float32, -bound, bound)
        b = jax.random.uniform(kb, (fan_out,), jnp.float32, -bound, bound)
        return w, b

    k1, k2, k3 = jax.random.split(key, 3)
    w1, b1 = linear(k1, input_dims, fc1_dims)
    w2, b2 = linear(k2, fc1_dims, fc2_dims)
    w3, b3 = linear(k3, fc2_dims, n_actions)
    return {"w1": w1, "b1": b1, "w2": w2, "b2": b2, "w3": w3, "b3": b3}


def prepare_dqn_params(params):
    """One-time prep:
      * hidden / output feature dims padded to 128-lane multiples (zero padding is
        exact for x@W+b); input_dims is left UNPADDED (the W1 block equals the
        full array, and x ships only its real columns),
      * weights cast to bf16 for the MXU (deliberate precision tradeoff),
      * the 3 biases packed into one lane-dense f32 array.
    """
    w1, b1 = params["w1"], params["b1"]
    w2, b2 = params["w2"], params["b2"]
    w3, b3 = params["w3"], params["b3"]

    d_in, f1 = w1.shape
    f2 = w2.shape[1]
    na = w3.shape[1]
    f1_p = _round_up(f1, LANE)
    f2_p = _round_up(f2, LANE)
    na_p = _round_up(na, LANE)

    def pad_cols(w, cp):
        return jnp.pad(w, ((0, 0), (0, cp - w.shape[1])))

    def pad2(w, rp, cp):
        return jnp.pad(w, ((0, rp - w.shape[0]), (0, cp - w.shape[1])))

    w1p = pad_cols(w1, f1_p).astype(jnp.bfloat16)            # (d_in, f1_p)
    w2p = pad2(w2, f1_p, f2_p).astype(jnp.bfloat16)          # (f1_p, f2_p)
    w3p = pad2(w3, f2_p, na_p).astype(jnp.bfloat16)          # (f2_p, na_p)

    wmax = max(f1_p, f2_p, na_p)
    b_packed = jnp.zeros((3, wmax), jnp.float32)
    b_packed = b_packed.at[0, :f1].set(b1.reshape(-1))
    b_packed = b_packed.at[1, :f2].set(b2.reshape(-1))
    b_packed = b_packed.at[2, :na].set(b3.reshape(-1))

    return {"w1": w1p, "w2": w2p, "w3": w3p, "b": b_packed,
            "input_dims": int(d_in), "n_actions": int(na)}


# ----------------------------------------------------------------------------- wrapper
def dqn_forward(state, kparams):
    """state: (B, input_dims) float. kparams: output of prepare_dqn_params."""
    w1p, w2p, w3p, bp = kparams["w1"], kparams["w2"], kparams["w3"], kparams["b"]
    d_in = kparams["input_dims"]
    n_actions = kparams["n_actions"]

    assert state.ndim == 2 and state.shape[1] == d_in, \
        f"expected state of shape (B, {d_in}), got {state.shape}"

    f1_p = w1p.shape[1]
    f2_p = w2p.shape[1]
    na_p = w3p.shape[1]
    wmax = bp.shape[1]

    B = state.shape[0]
    b8 = _round_up(B, SUBLANE)
    tb = _choose_tb(b8)
    b_pad = _round_up(b8, tb)

    # Cast to bf16 (matmul input dtype) and pad only the batch axis; no feature pad.
    x = state.astype(jnp.bfloat16)
    if b_pad != B:
        x = jnp.pad(x, ((0, b_pad - B), (0, 0)))

    grid = (b_pad // tb,)

    # Advisory cost estimate for XLA scheduling inside a larger jitted step.
    flops = 2 * b_pad * (d_in * f1_p + f1_p * f2_p + f2_p * na_p)
    bytes_accessed = (x.size * 2 + (w1p.size + w2p.size + w3p.size) * 2
                      + bp.size * 4 + b_pad * na_p * 4)
    cost = pl.CostEstimate(flops=flops, transcendentals=0,
                           bytes_accessed=bytes_accessed)

    # VMEM budget: double-buffered bf16 x tile + f32 out tile, resident bf16
    # weights (compiler still reserves 2 buffers per input), packed biases, plus
    # headroom for f32 intermediates; clamp under v7x's 64 MiB physical VMEM.
    vmem_bytes = (2 * tb * d_in * 2
                  + 2 * tb * na_p * 4
                  + 2 * (w1p.size + w2p.size + w3p.size) * 2
                  + 2 * SUBLANE * wmax * 4
                  + 4 * tb * max(f1_p, f2_p) * 4)
    vmem_limit = int(min(64 * 1024 * 1024, max(8 * 1024 * 1024, 4 * vmem_bytes)))

    out_padded = pl.pallas_call(
        dqn_forward_kernel,
        out_shape=jax.ShapeDtypeStruct((b_pad, na_p), jnp.float32),
        grid=grid,
        in_specs=[
            pl.BlockSpec((tb, d_in), lambda i: (i, 0)),        # x: blocked on batch, unpadded d_in
            pl.BlockSpec((d_in, f1_p), lambda i: (0, 0)),      # weights: resident (constant index_map)
            pl.BlockSpec((f1_p, f2_p), lambda i: (0, 0)),
            pl.BlockSpec((f2_p, na_p), lambda i: (0, 0)),
            pl.BlockSpec((3, wmax), lambda i: (0, 0)),         # packed biases
        ],
        out_specs=pl.BlockSpec((tb, na_p), lambda i: (i, 0)),  # lane-dense output
        compiler_params=pltpu.CompilerParams(
            dimension_semantics=("parallel",),                  # v7x: 2 TCs share batch steps
            vmem_limit_bytes=vmem_limit),
        cost_estimate=cost,
    )(x, w1p, w2p, w3p, bp)

    return out_padded[:B, :n_actions]


# ----------------------------------------------------------------------------- references
def dqn_forward_ref_f32(state, params):
    h1 = jnp.maximum(state @ params["w1"] + params["b1"], 0.0)
    h2 = jnp.maximum(h1 @ params["w2"] + params["b2"], 0.0)
    return h2 @ params["w3"] + params["b3"]


def dqn_forward_ref_bf16(state, params):
    # Matches the kernel's numerics: bf16 matmul operands, f32 accumulate,
    # f32 bias add + ReLU.
    def mm(a, w):
        return jnp.dot(a.astype(jnp.bfloat16), w.astype(jnp.bfloat16),
                       preferred_element_type=jnp.float32)
    h1 = jnp.maximum(mm(state, params["w1"]) + params["b1"], 0.0)
    h2 = jnp.maximum(mm(h1, params["w2"]) + params["b2"], 0.0)
    return mm(h2, params["w3"]) + params["b3"]


if __name__ == "__main__":
    # Small shapes consistent with DeepQNetwork(lr, input_dims, fc1, fc2, n_actions).
    batch = 8
    input_dims = 16
    fc1_dims = 64
    fc2_dims = 64
    n_actions = 8

    key = jax.random.PRNGKey(0)
    k_params, k_state = jax.random.split(key)

    params = init_dqn_params(k_params, input_dims, fc1_dims, fc2_dims, n_actions)
    kparams = prepare_dqn_params(params)                  # one-time padding/packing
    state = jax.random.normal(k_state, (batch, input_dims), dtype=jnp.float32)

    actions = dqn_forward(state, kparams)
    actions = jax.block_until_ready(actions)

    assert actions.shape == (batch, n_actions)

    # Tight check vs a reference with the same bf16-matmul / f32-accumulate numerics.
    expected_bf16 = dqn_forward_ref_bf16(state, params)
    assert jnp.allclose(actions, expected_bf16, atol=1e-3, rtol=1e-3), \
        "mismatch vs bf16-matched reference"

    # Loose check vs the pure-f32 PyTorch-equivalent forward (bf16 weight rounding).
    expected_f32 = dqn_forward_ref_f32(state, params)
    assert jnp.allclose(actions, expected_f32, atol=5e-2, rtol=5e-2), \
        "mismatch vs f32 reference"

    print("KERNEL_OK")
</pallas_src>

<mosaic_0001>
module attributes {stable_mosaic.version = 11 : i64} {
  func.func @dqn_forward_kernel(%arg0: i32, %arg1: memref<8x16xbf16, #tpu.memory_space<vmem>>, %arg2: memref<16x128xbf16, #tpu.memory_space<vmem>>, %arg3: memref<128x128xbf16, #tpu.memory_space<vmem>>, %arg4: memref<128x128xbf16, #tpu.memory_space<vmem>>, %arg5: memref<3x128xf32, #tpu.memory_space<vmem>>, %arg6: memref<8x128xf32, #tpu.memory_space<vmem>>) attributes {dimension_semantics = [#tpu.dimension_semantics<parallel>], iteration_bounds = array<i64: 1>, scalar_prefetch = 0 : i64, scratch_operands = 0 : i64, tpu.core_type = #tpu.core_type<tc>, window_params = [{transform_indices = @transform_0, window_bounds = array<i64: 8, 16>}, {pipeline_mode = #tpu.pipeline_mode<synchronous>, transform_indices = @transform_1, window_bounds = array<i64: 16, 128>}, {pipeline_mode = #tpu.pipeline_mode<synchronous>, transform_indices = @transform_2, window_bounds = array<i64: 128, 128>}, {pipeline_mode = #tpu.pipeline_mode<synchronous>, transform_indices = @transform_3, window_bounds = array<i64: 128, 128>}, {pipeline_mode = #tpu.pipeline_mode<synchronous>, transform_indices = @transform_4, window_bounds = array<i64: 3, 128>}, {transform_indices = @transform_5, window_bounds = array<i64: 8, 128>}]} {
    %c0 = arith.constant 0 : index
    %c0_0 = arith.constant 0 : index
    %0 = vector.load %arg5[%c0, %c0_0] : memref<3x128xf32, #tpu.memory_space<vmem>>, vector<3x128xf32>
    %c0_1 = arith.constant 0 : index
    %c0_2 = arith.constant 0 : index
    %1 = vector.load %arg1[%c0_1, %c0_2] : memref<8x16xbf16, #tpu.memory_space<vmem>>, vector<8x16xbf16>
    %c0_3 = arith.constant 0 : index
    %c0_4 = arith.constant 0 : index
    %2 = vector.load %arg2[%c0_3, %c0_4] : memref<16x128xbf16, #tpu.memory_space<vmem>>, vector<16x128xbf16>
    %cst = arith.constant dense<0.000000e+00> : vector<8x128xf32>
    %3 = tpu.matmul %1, %2, %cst {dimension_numbers = #tpu.dot_dimension_numbers<[1], [0], [0], [1], [0, 0, 1, 1], [], []>} : vector<8x16xbf16>, vector<16x128xbf16>, vector<8x128xf32> -> vector<8x128xf32>
    %4 = vector.extract_strided_slice %0 {offsets = [0, 0], sizes = [1, 128], strides = [1, 1]} : vector<3x128xf32> to vector<1x128xf32>
    %5 = vector.broadcast %4 : vector<1x128xf32> to vector<8x128xf32>
    %6 = arith.addf %3, %5 : vector<8x128xf32>
    %cst_5 = arith.constant 0.000000e+00 : f32
    %7 = vector.broadcast %cst_5 : f32 to vector<8x128xf32>
    %8 = arith.maximumf %6, %7 : vector<8x128xf32>
    %9 = arith.truncf %8 : vector<8x128xf32> to vector<8x128xbf16>
    %c0_6 = arith.constant 0 : index
    %c0_7 = arith.constant 0 : index
    %10 = vector.load %arg3[%c0_6, %c0_7] : memref<128x128xbf16, #tpu.memory_space<vmem>>, vector<128x128xbf16>
    %cst_8 = arith.constant dense<0.000000e+00> : vector<8x128xf32>
    %11 = tpu.matmul %9, %10, %cst_8 {dimension_numbers = #tpu.dot_dimension_numbers<[1], [0], [0], [1], [0, 0, 1, 1], [], []>} : vector<8x128xbf16>, vector<128x128xbf16>, vector<8x128xf32> -> vector<8x128xf32>
    %12 = vector.extract_strided_slice %0 {offsets = [1, 0], sizes = [1, 128], strides = [1, 1]} : vector<3x128xf32> to vector<1x128xf32>
    %13 = vector.broadcast %12 : vector<1x128xf32> to vector<8x128xf32>
    %14 = arith.addf %11, %13 : vector<8x128xf32>
    %cst_9 = arith.constant 0.000000e+00 : f32
    %15 = vector.broadcast %cst_9 : f32 to vector<8x128xf32>
    %16 = arith.maximumf %14, %15 : vector<8x128xf32>
    %17 = arith.truncf %16 : vector<8x128xf32> to vector<8x128xbf16>
    %c0_10 = arith.constant 0 : index
    %c0_11 = arith.constant 0 : index
    %18 = vector.load %arg4[%c0_10, %c0_11] : memref<128x128xbf16, #tpu.memory_space<vmem>>, vector<128x128xbf16>
    %cst_12 = arith.constant dense<0.000000e+00> : vector<8x128xf32>
    %19 = tpu.matmul %17, %18, %cst_12 {dimension_numbers = #tpu.dot_dimension_numbers<[1], [0], [0], [1], [0, 0, 1, 1], [], []>} : vector<8x128xbf16>, vector<128x128xbf16>, vector<8x128xf32> -> vector<8x128xf32>
    %20 = vector.extract_strided_slice %0 {offsets = [2, 0], sizes = [1, 128], strides = [1, 1]} : vector<3x128xf32> to vector<1x128xf32>
    %21 = vector.broadcast %20 : vector<1x128xf32> to vector<8x128xf32>
    %22 = arith.addf %19, %21 : vector<8x128xf32>
    %c0_13 = arith.constant 0 : index
    %c0_14 = arith.constant 0 : index
    %23 = vector.load %arg6[%c0_13, %c0_14] : memref<8x128xf32, #tpu.memory_space<vmem>>, vector<8x128xf32>
    tpu.vector_store %arg6[%c0_13, %c0_14], %22 {strides = array<i32>} : memref<8x128xf32, #tpu.memory_space<vmem>>, vector<8x128xf32>,
    return
  }
  func.func @transform_0(%arg0: i32) -> (i32, i32) {
    %c0_i32 = arith.constant 0 : i32
    %c0_i32_0 = arith.constant 0 : i32
    return %arg0, %c0_i32 : i32, i32
  }
  func.func @transform_1(%arg0: i32) -> (i32, i32) {
    %c0_i32 = arith.constant 0 : i32
    %c0_i32_0 = arith.constant 0 : i32
    %c0_i32_1 = arith.constant 0 : i32
    return %c0_i32, %c0_i32_0 : i32, i32
  }
  func.func @transform_2(%arg0: i32) -> (i32, i32) {
    %c0_i32 = arith.constant 0 : i32
    %c0_i32_0 = arith.constant 0 : i32
    %c0_i32_1 = arith.constant 0 : i32
    return %c0_i32, %c0_i32_0 : i32, i32
  }
  func.func @transform_3(%arg0: i32) -> (i32, i32) {
    %c0_i32 = arith.constant 0 : i32
    %c0_i32_0 = arith.constant 0 : i32
    %c0_i32_1 = arith.constant 0 : i32
    return %c0_i32, %c0_i32_0 : i32, i32
  }
  func.func @transform_4(%arg0: i32) -> (i32, i32) {
    %c0_i32 = arith.constant 0 : i32
    %c0_i32_0 = arith.constant 0 : i32
    %c0_i32_1 = arith.constant 0 : i32
    return %c0_i32, %c0_i32_0 : i32, i32
  }
  func.func @transform_5(%arg0: i32) -> (i32, i32) {
    %c0_i32 = arith.constant 0 : i32
    %c0_i32_0 = arith.constant 0 : i32
    return %arg0, %c0_i32 : i32, i32
  }
}

</mosaic_0001>

<bundles_post_ra>
// kernel: tpu_custom_call.1
= control target key start
LH: loop header
LB: loop body
LE: loop exit
PB: predicated region body
PF: predicated region fallthrough
CT: control target
= control target key end

     0   :  { %10 = vsyncpa [#allocation3], 0  ;;  %s606_s0 = inlined_call_operand.hbm [shape: bf16[8,16], index: 0, kind: input, shape index: {}]   ;;  %s607_s1 = inlined_call_operand.hbm [shape: bf16[16,128], index: 1, kind: input, shape index: {}]   ;;  %s608_s2 = inlined_call_operand.hbm [shape: bf16[128,128], index: 2, kind: input, shape index: {}]   ;;  %s609_s3 = inlined_call_operand.hbm [shape: bf16[128,128], index: 3, kind: input, shape index: {}]   ;;  %s610_s4 = inlined_call_operand.hbm [shape: f32[3,128], index: 4, kind: input, shape index: {}]   ;;  %s611_s5 = inlined_call_operand.hbm [shape: f32[8,128], index: 5, kind: output, shape index: {}]  }
   0x1   :  { %11 = vsyncpa [#allocation6], 0 }
   0x2   :  { %12 = vsyncpa [#allocation9], 0  ;;  %s29_s20 = sshll.u32 %s607_s1, 4  ;;  %s30_s20 = int_to_ptr.hbm [resolvable:$true] %s29_s20 }
   0x3   :  { %13 = vsyncpa [#allocation4], 0  ;;  %s550_s21 = smov [#allocation5]   ;;  %s55_s25 = sshll.u32 %s609_s3, 4  ;;  %s56_s25 = int_to_ptr.hbm [resolvable:$true] %s55_s25 }
   0x4   :  { %s31_s22 = sshll.u32 %s550_s21, 4  ;;  %s551_s26 = smov 64   ;;  %s32_s22 = int_to_ptr.vmem [resolvable:$true] %s31_s22 }
   0x5   :  { %s552_s27 = smov 4   ;;  %s553_s28 = smov [#allocation8]  }
   0x6   :  { %37 = dma.hbm_to_vmem [thread:$0]  %s30_s20, 128, %s32_s22, [#allocation6], %s551_s26, %s551_s26, %s552_s27  }
   0x7   :  { %s57_s29 = sshll.u32 %s553_s28, 4  ;;  %s19_s7 = sshll.u32 %s606_s0, 4  ;;  %s58_s29 = int_to_ptr.vmem [resolvable:$true] %s57_s29  ;;  %s20_s7 = int_to_ptr.hbm [resolvable:$true] %s19_s7 }
   0x8   :  { %63 = dma.hbm_to_vmem [thread:$0]  %s56_s25, 1024, %s58_s29, [#allocation9], %s551_s26, %s551_s26, %s552_s27  }
   0x9   :  { %s42_s9 = sshll.u32 %s608_s2, 4  ;;  %s554_s10 = smov [#allocation2]   ;;  %s43_s9 = int_to_ptr.hbm [resolvable:$true] %s42_s9 }
   0xa   :  { %s21_s11 = sshll.u32 %s554_s10, 4  ;;  %s555_s3 = smov [#allocation7]   ;;  %s22_s11 = int_to_ptr.vmem [resolvable:$true] %s21_s11 }
   0xb   :  { %24 = dma.hbm_to_vmem [thread:$0]  %s20_s7, 64, %s22_s11, [#allocation3]  }
   0xc   :  { %s44_s12 = sshll.u32 %s555_s3, 4  ;;  %s69_s15 = sshll.u32 %s610_s4, 4  ;;  %s45_s12 = int_to_ptr.vmem [resolvable:$true] %s44_s12  ;;  %s70_s15 = int_to_ptr.hbm [resolvable:$true] %s69_s15 }
   0xd   :  { %50 = dma.hbm_to_vmem [thread:$0]  %s43_s9, 1024, %s45_s12, [#allocation6], %s551_s26, %s551_s26, %s552_s27  }
   0xe   :  { %s556_s0 = smov [#allocation10]  }
   0xf   :  { %s71_s16 = sshll.u32 %s556_s0, 4  ;;  %s72_s16 = int_to_ptr.vmem [resolvable:$true] %s71_s16 }
  0x10   :  { %74 = dma.hbm_to_vmem [thread:$0]  %s70_s15, 64, %s72_s16, [#allocation9]  }
  0x11   :  { %542 = dma.done.wait [#allocation3], 64  }
  0x12   :  { %543 = vsyncadd [#allocation3], 4294967232 }
  0x13   :  { %544 = dma.done.wait [#allocation6], 1152  }
  0x14   :  { %545 = vsyncadd [#allocation6], 4294966144 }
  0x15   :  { %546 = dma.done.wait [#allocation9], 1088  }
  0x16   :  { %547 = vsyncadd [#allocation9], 4294966208  ;;  %v373_v0 = vld [vmem:[#allocation5] sm:$0xff]  ;;  %v97_v2 = vld [vmem:[#allocation2] sm:$0xf]  ;;  %vm107_vm0 = vcmask 130048  }
  0x17   :  { %v381_v1 = vld [vmem:[#allocation7 + $0x38] sm:$0xff]  ;;  %118 = vmatpush.bf16.msra.mxu0 %v373_v0  ;;  %v380_v3 = vld [vmem:[#allocation7 + $0x30] sm:$0xff]  ;;  %v379_v4 = vld [vmem:[#allocation7 + $0x28] sm:$0xff]  ;;  %s557_s2 = smov [#allocation11]   ;;  %s292_s19 = sshll.u32 %s611_s5, 4  ;;  %s293_s19 = int_to_ptr.hbm [resolvable:$true] %s292_s19 }
  0x18   :  { %191 = vmatpush.bf16.msra.mxu1 %v381_v1  ;;  %v378_v5 = vld [vmem:[#allocation7 + $0x20] sm:$0xff]  ;;  %v377_v6 = vld [vmem:[#allocation7 + $0x18] sm:$0xff]  ;;  %v376_v7 = vld [vmem:[#allocation7 + $0x10] sm:$0xff]  ;;  %s290_s4 = sshll.u32 %s557_s2, 4  ;;  %s291_s4 = int_to_ptr.vmem [resolvable:$true] %s290_s4 }
  0x19   :  { %v375_v8 = vld [vmem:[#allocation7 + $0x8] sm:$0xff]  ;;  %v374_v9 = vld [vmem:[#allocation7] sm:$0xff]  ;;  %v389_v10 = vld [vmem:[#allocation8 + $0x38] sm:$0xff] }
  0x1a   :  { %308 = vmatmul.msk.bf16.vlgmr.msra.gmra.mxu0 %vm107_vm0, %v97_v2  ;;  %271 = vmatpush.bf16.msra.mxu2 %v389_v10  ;;  %v388_v11 = vld [vmem:[#allocation8 + $0x30] sm:$0xff]  ;;  %v387_v12 = vld [vmem:[#allocation8 + $0x28] sm:$0xff]  ;;  %v386_v13 = vld [vmem:[#allocation8 + $0x20] sm:$0xff] }
  0x1b   :  { %v385_v14 = vld [vmem:[#allocation8 + $0x18] sm:$0xff]  ;;  %v96_v15 = vld [vmem:[#allocation10] sm:$0x7]  ;;  %v384_v16 = vld [vmem:[#allocation8 + $0x10] sm:$0xff] }
  0x1c   :  { %192 = vmatpush.bf16.msra.mxu1 %v380_v3  ;;  %v100_v17 = vperm.slane %v96_v15, 0  ;;  %v383_v23 = vld [vmem:[#allocation8 + $0x8] sm:$0xff]  ;;  %v382_v24 = vld [vmem:[#allocation8] sm:$0xff]  ;;  %v142_v25 = vperm.slane %v96_v15, 1  ;;  %v222_v31 = vperm.slane %v96_v15, 2 }
  0x1e   :  { %272 = vmatpush.bf16.msra.mxu2 %v388_v11 }
  0x20   :  { %193 = vmatpush.bf16.msra.mxu1 %v379_v4 }
  0x22   :  { %273 = vmatpush.bf16.msra.mxu2 %v387_v12 }
  0x24   :  { %194 = vmatpush.bf16.msra.mxu1 %v378_v5 }
  0x26   :  { %274 = vmatpush.bf16.msra.mxu2 %v386_v13 }
  0x28   :  { %195 = vmatpush.bf16.msra.mxu1 %v377_v6 }
  0x2a   :  { %275 = vmatpush.bf16.msra.mxu2 %v385_v14 }
  0x2c   :  { %196 = vmatpush.bf16.msra.mxu1 %v376_v7 }
  0x2e   :  { %276 = vmatpush.bf16.msra.mxu2 %v384_v16 }
  0x30   :  { %197 = vmatpush.bf16.msra.mxu1 %v375_v8 }
  0x32   :  { %277 = vmatpush.bf16.msra.mxu2 %v383_v23 }
  0x34   :  { %198 = vmatpush.bf16.msra.mxu1 %v374_v9 }
  0x36   :  { %278 = vmatpush.bf16.msra.mxu2 %v382_v24 }
  0x97   :  { %v120_v18 = vpop.f32.mrf.mxu0 }
  0x98   :  { %v121_v19 = vadd.f32 %v120_v18, %v100_v17 }
  0x9a   :  { %v124_v20 = vmax.f32 %v121_v19, 0.0 }
  0x9c   :  { %v125_v21 = vpack.c.bf16 %v124_v20, %v124_v20 }
  0x9e   :  { %199 = vmatmul.bf16.vlgmr.msra.gmra.mxu1 %v125_v21 }
  0x9f   :  { %v122_v22 = vpop.f32.mrf.mxu0 }
 0x11b   :  { %v200_v26 = vpop.f32.mrf.mxu1 }
 0x11c   :  { %v201_v27 = vadd.f32 %v200_v26, %v142_v25 }
 0x11e   :  { %v204_v28 = vmax.f32 %v201_v27, 0.0 }
 0x120   :  { %v205_v29 = vpack.c.bf16 %v204_v28, %v204_v28 }
 0x122   :  { %279 = vmatmul.bf16.vlgmr.msra.gmra.mxu2 %v205_v29 }
 0x123   :  { %v202_v30 = vpop.f32.mrf.mxu1 }
 0x1a5   :  { %v280_v32 = vpop.f32.mrf.mxu2 }
 0x1a6   :  { %v281_v33 = vadd.f32 %v280_v32, %v222_v31 }
 0x1a8   :  { %284 = vst [vmem:[#allocation11] sm:$0xff] %v281_v33 }
 0x1a9   :  { %295 = dma.vmem_to_hbm [thread:$0]  %s291_s4, 128, %s293_s19, [#allocation4]  }
 0x1ad   :  { %v282_v34 = vpop.f32.mrf.mxu2 }
 0x1ae   :  { %548 = dma.done.wait [#allocation4], 128  }
 0x1af   :  { %549 = vsyncadd [#allocation4], 4294967168 }
 0x1b0   :  { %300 = vsyncpa [#allocation3], 1 }
 0x1b1   :  { %301 = vsyncpa [#allocation6], 1 }
 0x1b2   :  { %302 = vsyncpa [#allocation9], 1 }
 0x1b3   :  { %303 = vsyncpa [#allocation4], 1 }

</bundles_post_ra>
